<compile_context>
chip_gen: v7x
topology: tpu7x:2x2x1
jax: 0.10.0
libtpu: 0.0.40
codegen_flags: <defaults>
</compile_context>

<pallas_src>
import functools
import math

import jax
import jax.numpy as jnp
from jax.experimental import pallas as pl
from jax.experimental.pallas import tpu as pltpu


def _round_up(x, m):
    return ((x + m - 1) // m) * m


def _cdiv(a, b):
    return -(-a // b)


# ----------------------------------------------------------------------------
# Pallas kernel: fused 3-layer MLP (one batch tile per grid step)
#   h0 = relu(z @ W0_z + onehot(c) @ W0_c + b0)   (Dropout -> identity)
#   h1 = relu(h0 @ W1 + b1)                        (Dropout -> identity)
#   y  = sigmoid(h1 @ W2 + b2)
# W0_c is pre-split into (row 0 folded into b0) + delta rows, so the one-hot
# contribution is a per-row select/mul-add on the VPU (hides under the MXU).
# ----------------------------------------------------------------------------
def _decoder_mlp_kernel(*refs, num_labels):
    if num_labels > 0:
        (z_ref, c_ref, w0z_ref, w0d_ref, b0_ref,
         w1_ref, b1_ref, w2_ref, b2_ref, out_ref) = refs
    else:
        (z_ref, w0z_ref, b0_ref,
         w1_ref, b1_ref, w2_ref, b2_ref, out_ref) = refs

    # z already bf16 (pre-cast in wrapper): no in-kernel cast, half the DMA.
    h0 = jnp.dot(z_ref[...], w0z_ref[...], preferred_element_type=jnp.float32)
    h0 = h0 + b0_ref[...]

    if num_labels > 0:
        lbl = c_ref[...]                       # (tm, 1) f32 label ids (pad=0)
        if num_labels == 2:
            # onehot(c) @ W0_c == W0_c[0] (already in b0) + c * (W0_c[1]-W0_c[0])
            h0 = h0 + lbl * w0d_ref[...]       # single mul-add over the tile
        else:
            for l in range(1, num_labels):     # static, tiny
                h0 = h0 + jnp.where(lbl == float(l), 1.0, 0.0) * w0d_ref[l - 1:l, :]

    # TODO(synk): training-mode Dropout(p=0.25) not implemented (inference pass)
    h0 = jnp.maximum(h0, 0.0)

    h1 = jnp.dot(h0.astype(jnp.bfloat16), w1_ref[...],
                 preferred_element_type=jnp.float32)
    h1 = jnp.maximum(h1 + b1_ref[...], 0.0)

    h2 = jnp.dot(h1.astype(jnp.bfloat16), w2_ref[...],
                 preferred_element_type=jnp.float32)
    h2 = h2 + b2_ref[...]

    # sigmoid(x) = 0.5*tanh(x/2) + 0.5 -> transcendental lands on the EUP slot.
    # Store in bf16: the output tile dominates this kernel's HBM traffic.
    out_ref[...] = (0.5 * jnp.tanh(0.5 * h2) + 0.5).astype(out_ref.dtype)


# ----------------------------------------------------------------------------
# Parameter prep: split W0 into latent / label parts, fold label-0 row into b0
# and keep only delta rows, pad hidden & output dims to multiples of 128
# (lane-dense), cast matmul weights to bf16.
# ----------------------------------------------------------------------------
def prepare_decoder_params(raw_params, latent_size, num_labels, conditional):
    w0, b0, w1, b1, w2, b2 = raw_params
    # Accept (fan_out,) torch-style or (1, fan_out) biases.
    b0, b1, b2 = (jnp.asarray(b).reshape(1, -1) for b in (b0, b1, b2))

    H = w0.shape[1]
    O = w2.shape[1]
    Hp = _round_up(H, 128)
    Op = _round_up(O, 128)

    if conditional:
        w0z = w0[:latent_size]
        w0c = w0[latent_size:latent_size + num_labels]
        b0 = b0 + w0c[0:1, :]                  # fold label-0 row into the bias
        w0d = w0c[1:] - w0c[0:1, :]            # delta rows, (num_labels-1, H)
    else:
        w0z, w0d = w0, None

    pad_c = lambda a, n: jnp.pad(a, ((0, 0), (0, n - a.shape[1])))
    pad_r = lambda a, n: jnp.pad(a, ((0, n - a.shape[0]), (0, 0)))

    return dict(
        w0z=pad_c(w0z, Hp).astype(jnp.bfloat16),
        w0d=pad_c(w0d, Hp) if conditional else None,   # f32: VPU add path
        b0=pad_c(b0, Hp),
        w1=pad_c(pad_r(w1, Hp), Hp).astype(jnp.bfloat16),
        b1=pad_c(b1, Hp),
        w2=pad_c(pad_r(w2, Hp), Op).astype(jnp.bfloat16),
        b2=pad_c(b2, Op),
        hidden_padded=Hp,
        out_dim=O,
        out_dim_padded=Op,
    )


# ----------------------------------------------------------------------------
# Batch-tile selection:
#   - sublane aligned (16 rows for bf16 activations, 8 when B < 16)
#   - >= 2 grid steps when there is enough work (v7x: both TensorCores busy)
#   - tm re-fit to the step count so padding waste stays < one alignment unit
#     per step (avoids e.g. B=300 / tm=256 -> 212 dead rows).
# ----------------------------------------------------------------------------
def _choose_batch_tile(B, tile_m):
    align = 16 if B >= 16 else 8
    b_unit = _round_up(B, align)
    tm = min(_round_up(tile_m, align), b_unit)
    n_steps = _cdiv(b_unit, tm)
    if n_steps < 2 and b_unit >= 2 * align:
        n_steps = 2                       # v7x megacore: keep both TCs fed
    tm = _round_up(_cdiv(b_unit, n_steps), align)
    return tm, n_steps, tm * n_steps


# ----------------------------------------------------------------------------
# Wrapper: batch-tiled pallas_call with VMEM-resident weights.
# ----------------------------------------------------------------------------
def decoder_forward_pallas(z, c, prep, *, num_labels, conditional,
                           tile_m=512, out_dtype=jnp.float32):
    B, L = z.shape
    Hp = prep["hidden_padded"]
    O, Op = prep["out_dim"], prep["out_dim_padded"]

    tm, n_steps, Bp = _choose_batch_tile(B, tile_m)
    grid = (n_steps,)

    z16 = z.astype(jnp.bfloat16)               # half the activation DMA bytes
    if Bp != B:
        z16 = jnp.pad(z16, ((0, Bp - B), (0, 0)))

    const2d = lambda shape: pl.BlockSpec(shape, lambda i: (0, 0))

    in_specs = [pl.BlockSpec((tm, L), lambda i: (i, 0))]
    args = [z16]
    if conditional:
        c2d = c.reshape(B, 1).astype(jnp.float32)
        if Bp != B:
            # padded rows -> label 0 (zero delta contribution); sliced off below
            c2d = jnp.pad(c2d, ((0, Bp - B), (0, 0)))
        in_specs.append(pl.BlockSpec((tm, 1), lambda i: (i, 0)))
        args.append(c2d)
        in_specs += [const2d(prep["w0z"].shape), const2d(prep["w0d"].shape),
                     const2d(prep["b0"].shape)]
        args += [prep["w0z"], prep["w0d"], prep["b0"]]
    else:
        in_specs += [const2d(prep["w0z"].shape), const2d(prep["b0"].shape)]
        args += [prep["w0z"], prep["b0"]]
    in_specs += [const2d(prep["w1"].shape), const2d(prep["b1"].shape),
                 const2d(prep["w2"].shape), const2d(prep["b2"].shape)]
    args += [prep["w1"], prep["b1"], prep["w2"], prep["b2"]]

    kernel = functools.partial(
        _decoder_mlp_kernel, num_labels=num_labels if conditional else 0)

    # Advisory cost estimate so XLA schedules/overlaps neighbours correctly.
    in_bytes = sum(int(a.size) * a.dtype.itemsize for a in args)
    out_bytes = Bp * Op * 2                                    # bf16 writeback
    cost = pl.CostEstimate(
        flops=int(2 * Bp * (L * Hp + Hp * Hp + Hp * Op)),
        transcendentals=int(Bp * Op),
        bytes_accessed=int(in_bytes + out_bytes))

    out = pl.pallas_call(
        kernel,
        out_shape=jax.ShapeDtypeStruct((Bp, Op), jnp.bfloat16),
        grid=grid,
        in_specs=in_specs,
        out_specs=pl.BlockSpec((tm, Op), lambda i: (i, 0)),
        compiler_params=pltpu.CompilerParams(
            dimension_semantics=("parallel",),
            vmem_limit_bytes=48 * 1024 * 1024),
        cost_estimate=cost,
    )(*args)

    out = out[:B, :O]
    return out.astype(out_dtype) if out_dtype is not None else out


# ----------------------------------------------------------------------------
# Deterministic PyTorch-style init (weights stored transposed to [in, out]).
# ----------------------------------------------------------------------------
def init_decoder_params(key, input_size, layer_sizes):
    dims = [(input_size, layer_sizes[0]),
            (layer_sizes[0], layer_sizes[0]),
            (layer_sizes[0], layer_sizes[1])]
    params = []
    for fan_in, fan_out in dims:
        key, kw, kb = jax.random.split(key, 3)
        bound = 1.0 / math.sqrt(fan_in)
        w = jax.random.uniform(kw, (fan_in, fan_out), jnp.float32, -bound, bound)
        b = jax.random.uniform(kb, (1, fan_out), jnp.float32, -bound, bound)
        params.extend([w, b])
    return tuple(params)


# ----------------------------------------------------------------------------
# Pure-JAX f32 reference (mirrors the PyTorch forward, eval mode).
# ----------------------------------------------------------------------------
def idx2onehot(idx, n):
    if idx.ndim == 1:
        idx = idx[:, None]
    return jax.nn.one_hot(idx[:, 0], n, dtype=jnp.float32)


def decoder_forward_ref(z, c, raw_params, conditional):
    w0, b0, w1, b1, w2, b2 = raw_params
    if conditional:
        z = jnp.concatenate([z, idx2onehot(c, n=2)], axis=-1)
    h = jnp.maximum(z @ w0 + b0, 0.0)
    h = jnp.maximum(h @ w1 + b1, 0.0)
    return jax.nn.sigmoid(h @ w2 + b2)


if __name__ == "__main__":
    latent_size = 16
    num_labels = 2
    layer_sizes = [64, 128]          # [hidden, output]
    conditional = True
    input_size = latent_size + (num_labels if conditional else 0)

    key = jax.random.PRNGKey(0)
    k_z, k_c, k_p = jax.random.split(key, 3)

    raw_params = init_decoder_params(k_p, input_size, layer_sizes)
    prep = prepare_decoder_params(raw_params, latent_size, num_labels, conditional)

    # batch=8 -> single-step grid; batch=40 -> 2 "parallel" steps (v7x path)
    for batch in (8, 40):
        kz = jax.random.fold_in(k_z, batch)
        kc = jax.random.fold_in(k_c, batch)
        z = jax.random.normal(kz, (batch, latent_size), dtype=jnp.float32)
        c = jax.random.randint(kc, (batch,), 0, num_labels, dtype=jnp.int32)

        out = decoder_forward_pallas(z, c, prep, num_labels=num_labels,
                                     conditional=conditional)
        out = jax.block_until_ready(out)
        assert out.shape == (batch, layer_sizes[1])

        ref = decoder_forward_ref(z, c, raw_params, conditional)
        max_err = float(jnp.max(jnp.abs(out - ref)))
        assert jnp.allclose(out, ref, atol=2e-2, rtol=2e-2), max_err

    print("KERNEL_OK")
</pallas_src>

<mosaic_0001>
module attributes {stable_mosaic.version = 11 : i64} {
  func.func @_decoder_mlp_kernel(%arg0: i32, %arg1: memref<8x16xbf16, #tpu.memory_space<vmem>>, %arg2: memref<8x1xf32, #tpu.memory_space<vmem>>, %arg3: memref<16x128xbf16, #tpu.memory_space<vmem>>, %arg4: memref<1x128xf32, #tpu.memory_space<vmem>>, %arg5: memref<1x128xf32, #tpu.memory_space<vmem>>, %arg6: memref<128x128xbf16, #tpu.memory_space<vmem>>, %arg7: memref<1x128xf32, #tpu.memory_space<vmem>>, %arg8: memref<128x128xbf16, #tpu.memory_space<vmem>>, %arg9: memref<1x128xf32, #tpu.memory_space<vmem>>, %arg10: memref<8x128xbf16, #tpu.memory_space<vmem>>) attributes {dimension_semantics = [#tpu.dimension_semantics<parallel>], iteration_bounds = array<i64: 1>, scalar_prefetch = 0 : i64, scratch_operands = 0 : i64, tpu.core_type = #tpu.core_type<tc>, window_params = [{transform_indices = @transform_0, window_bounds = array<i64: 8, 16>}, {transform_indices = @transform_1, window_bounds = array<i64: 8, 1>}, {pipeline_mode = #tpu.pipeline_mode<synchronous>, transform_indices = @transform_2, window_bounds = array<i64: 16, 128>}, {pipeline_mode = #tpu.pipeline_mode<synchronous>, transform_indices = @transform_3, window_bounds = array<i64: 1, 128>}, {pipeline_mode = #tpu.pipeline_mode<synchronous>, transform_indices = @transform_4, window_bounds = array<i64: 1, 128>}, {pipeline_mode = #tpu.pipeline_mode<synchronous>, transform_indices = @transform_5, window_bounds = array<i64: 128, 128>}, {pipeline_mode = #tpu.pipeline_mode<synchronous>, transform_indices = @transform_6, window_bounds = array<i64: 1, 128>}, {pipeline_mode = #tpu.pipeline_mode<synchronous>, transform_indices = @transform_7, window_bounds = array<i64: 128, 128>}, {pipeline_mode = #tpu.pipeline_mode<synchronous>, transform_indices = @transform_8, window_bounds = array<i64: 1, 128>}, {transform_indices = @transform_9, window_bounds = array<i64: 8, 128>}]} {
    %c0 = arith.constant 0 : index
    %c0_0 = arith.constant 0 : index
    %0 = vector.load %arg1[%c0, %c0_0] : memref<8x16xbf16, #tpu.memory_space<vmem>>, vector<8x16xbf16>
    %c0_1 = arith.constant 0 : index
    %c0_2 = arith.constant 0 : index
    %1 = vector.load %arg3[%c0_1, %c0_2] : memref<16x128xbf16, #tpu.memory_space<vmem>>, vector<16x128xbf16>
    %cst = arith.constant dense<0.000000e+00> : vector<8x128xf32>
    %2 = tpu.matmul %0, %1, %cst {dimension_numbers = #tpu.dot_dimension_numbers<[1], [0], [0], [1], [0, 0, 1, 1], [], []>} : vector<8x16xbf16>, vector<16x128xbf16>, vector<8x128xf32> -> vector<8x128xf32>
    %c0_3 = arith.constant 0 : index
    %c0_4 = arith.constant 0 : index
    %3 = vector.load %arg5[%c0_3, %c0_4] : memref<1x128xf32, #tpu.memory_space<vmem>>, vector<1x128xf32>
    %4 = vector.broadcast %3 : vector<1x128xf32> to vector<8x128xf32>
    %5 = arith.addf %2, %4 : vector<8x128xf32>
    %c0_5 = arith.constant 0 : index
    %c0_6 = arith.constant 0 : index
    %6 = vector.load %arg2[%c0_5, %c0_6] : memref<8x1xf32, #tpu.memory_space<vmem>>, vector<8x1xf32>
    %c0_7 = arith.constant 0 : index
    %c0_8 = arith.constant 0 : index
    %7 = vector.load %arg4[%c0_7, %c0_8] : memref<1x128xf32, #tpu.memory_space<vmem>>, vector<1x128xf32>
    %8 = vector.broadcast %6 : vector<8x1xf32> to vector<8x128xf32>
    %9 = vector.broadcast %7 : vector<1x128xf32> to vector<8x128xf32>
    %10 = arith.mulf %8, %9 : vector<8x128xf32>
    %11 = arith.addf %5, %10 : vector<8x128xf32>
    %cst_9 = arith.constant 0.000000e+00 : f32
    %12 = vector.broadcast %cst_9 : f32 to vector<8x128xf32>
    %13 = arith.maximumf %11, %12 : vector<8x128xf32>
    %14 = arith.truncf %13 : vector<8x128xf32> to vector<8x128xbf16>
    %c0_10 = arith.constant 0 : index
    %c0_11 = arith.constant 0 : index
    %15 = vector.load %arg6[%c0_10, %c0_11] : memref<128x128xbf16, #tpu.memory_space<vmem>>, vector<128x128xbf16>
    %cst_12 = arith.constant dense<0.000000e+00> : vector<8x128xf32>
    %16 = tpu.matmul %14, %15, %cst_12 {dimension_numbers = #tpu.dot_dimension_numbers<[1], [0], [0], [1], [0, 0, 1, 1], [], []>} : vector<8x128xbf16>, vector<128x128xbf16>, vector<8x128xf32> -> vector<8x128xf32>
    %c0_13 = arith.constant 0 : index
    %c0_14 = arith.constant 0 : index
    %17 = vector.load %arg7[%c0_13, %c0_14] : memref<1x128xf32, #tpu.memory_space<vmem>>, vector<1x128xf32>
    %18 = vector.broadcast %17 : vector<1x128xf32> to vector<8x128xf32>
    %19 = arith.addf %16, %18 : vector<8x128xf32>
    %cst_15 = arith.constant 0.000000e+00 : f32
    %20 = vector.broadcast %cst_15 : f32 to vector<8x128xf32>
    %21 = arith.maximumf %19, %20 : vector<8x128xf32>
    %22 = arith.truncf %21 : vector<8x128xf32> to vector<8x128xbf16>
    %c0_16 = arith.constant 0 : index
    %c0_17 = arith.constant 0 : index
    %23 = vector.load %arg8[%c0_16, %c0_17] : memref<128x128xbf16, #tpu.memory_space<vmem>>, vector<128x128xbf16>
    %cst_18 = arith.constant dense<0.000000e+00> : vector<8x128xf32>
    %24 = tpu.matmul %22, %23, %cst_18 {dimension_numbers = #tpu.dot_dimension_numbers<[1], [0], [0], [1], [0, 0, 1, 1], [], []>} : vector<8x128xbf16>, vector<128x128xbf16>, vector<8x128xf32> -> vector<8x128xf32>
    %c0_19 = arith.constant 0 : index
    %c0_20 = arith.constant 0 : index
    %25 = vector.load %arg9[%c0_19, %c0_20] : memref<1x128xf32, #tpu.memory_space<vmem>>, vector<1x128xf32>
    %26 = vector.broadcast %25 : vector<1x128xf32> to vector<8x128xf32>
    %27 = arith.addf %24, %26 : vector<8x128xf32>
    %cst_21 = arith.constant 5.000000e-01 : f32
    %28 = vector.broadcast %cst_21 : f32 to vector<8x128xf32>
    %29 = arith.mulf %28, %27 : vector<8x128xf32>
    %30 = math.tanh %29 : vector<8x128xf32>
    %cst_22 = arith.constant 5.000000e-01 : f32
    %31 = vector.broadcast %cst_22 : f32 to vector<8x128xf32>
    %32 = arith.mulf %31, %30 : vector<8x128xf32>
    %cst_23 = arith.constant 5.000000e-01 : f32
    %33 = vector.broadcast %cst_23 : f32 to vector<8x128xf32>
    %34 = arith.addf %32, %33 : vector<8x128xf32>
    %35 = arith.truncf %34 : vector<8x128xf32> to vector<8x128xbf16>
    %c0_24 = arith.constant 0 : index
    %c0_25 = arith.constant 0 : index
    %36 = vector.load %arg10[%c0_24, %c0_25] : memref<8x128xbf16, #tpu.memory_space<vmem>>, vector<8x128xbf16>
    tpu.vector_store %arg10[%c0_24, %c0_25], %35 {strides = array<i32>} : memref<8x128xbf16, #tpu.memory_space<vmem>>, vector<8x128xbf16>,
    return
  }
  func.func @transform_0(%arg0: i32) -> (i32, i32) {
    %c0_i32 = arith.constant 0 : i32
    %c0_i32_0 = arith.constant 0 : i32
    return %arg0, %c0_i32 : i32, i32
  }
  func.func @transform_1(%arg0: i32) -> (i32, i32) {
    %c0_i32 = arith.constant 0 : i32
    %c0_i32_0 = arith.constant 0 : i32
    return %arg0, %c0_i32 : i32, i32
  }
  func.func @transform_2(%arg0: i32) -> (i32, i32) {
    %c0_i32 = arith.constant 0 : i32
    %c0_i32_0 = arith.constant 0 : i32
    %c0_i32_1 = arith.constant 0 : i32
    return %c0_i32, %c0_i32_0 : i32, i32
  }
  func.func @transform_3(%arg0: i32) -> (i32, i32) {
    %c0_i32 = arith.constant 0 : i32
    %c0_i32_0 = arith.constant 0 : i32
    %c0_i32_1 = arith.constant 0 : i32
    return %c0_i32, %c0_i32_0 : i32, i32
  }
  func.func @transform_4(%arg0: i32) -> (i32, i32) {
    %c0_i32 = arith.constant 0 : i32
    %c0_i32_0 = arith.constant 0 : i32
    %c0_i32_1 = arith.constant 0 : i32
    return %c0_i32, %c0_i32_0 : i32, i32
  }
  func.func @transform_5(%arg0: i32) -> (i32, i32) {
    %c0_i32 = arith.constant 0 : i32
    %c0_i32_0 = arith.constant 0 : i32
    %c0_i32_1 = arith.constant 0 : i32
    return %c0_i32, %c0_i32_0 : i32, i32
  }
  func.func @transform_6(%arg0: i32) -> (i32, i32) {
    %c0_i32 = arith.constant 0 : i32
    %c0_i32_0 = arith.constant 0 : i32
    %c0_i32_1 = arith.constant 0 : i32
    return %c0_i32, %c0_i32_0 : i32, i32
  }
  func.func @transform_7(%arg0: i32) -> (i32, i32) {
    %c0_i32 = arith.constant 0 : i32
    %c0_i32_0 = arith.constant 0 : i32
    %c0_i32_1 = arith.constant 0 : i32
    return %c0_i32, %c0_i32_0 : i32, i32
  }
  func.func @transform_8(%arg0: i32) -> (i32, i32) {
    %c0_i32 = arith.constant 0 : i32
    %c0_i32_0 = arith.constant 0 : i32
    %c0_i32_1 = arith.constant 0 : i32
    return %c0_i32, %c0_i32_0 : i32, i32
  }
  func.func @transform_9(%arg0: i32) -> (i32, i32) {
    %c0_i32 = arith.constant 0 : i32
    %c0_i32_0 = arith.constant 0 : i32
    return %arg0, %c0_i32 : i32, i32
  }
}

</mosaic_0001>

<bundles_post_ra>
// kernel: tpu_custom_call.1
= control target key start
LH: loop header
LB: loop body
LE: loop exit
PB: predicated region body
PF: predicated region fallthrough
CT: control target
= control target key end

     0   :  { %14 = vsyncpa [#allocation3], 0  ;;  %s711_s0 = inlined_call_operand.vmem [shape: bf16[8,16], index: 0, kind: input, shape index: {}]   ;;  %s712_s1 = inlined_call_operand.vmem [shape: f32[8,1], index: 1, kind: input, shape index: {}]   ;;  %s713_s2 = inlined_call_operand.vmem [shape: bf16[16,128], index: 2, kind: input, shape index: {}]   ;;  %s714_s3 = inlined_call_operand.vmem [shape: f32[1,128], index: 3, kind: input, shape index: {}]   ;;  %s715_s4 = inlined_call_operand.vmem [shape: f32[1,128], index: 4, kind: input, shape index: {}]   ;;  %s716_s5 = inlined_call_operand.hbm [shape: bf16[128,128], index: 5, kind: input, shape index: {}]   ;;  %s717_s6 = inlined_call_operand.vmem [shape: f32[1,128], index: 6, kind: input, shape index: {}]   ;;  %s718_s7 = inlined_call_operand.hbm [shape: bf16[128,128], index: 7, kind: input, shape index: {}]   ;;  %s719_s8 = inlined_call_operand.vmem [shape: f32[1,128], index: 8, kind: input, shape index: {}]   ;;  %s720_s9 = inlined_call_operand.hbm [shape: bf16[8,128], index: 9, kind: output, shape index: {}]  }
   0x1   :  { %15 = vsyncpa [#allocation6], 0 }
   0x2   :  { %16 = vsyncpa [#allocation4], 0  ;;  %s573_s30 = smov [#allocation2]   ;;  %s501_s13 = scalar_lea.hbm %s716_s5, 1024 }
   0x3   :  { %s32_s10 = sshll.u32 %s573_s30, 4  ;;  %p502_p0 = scmp.ne.s32.totalorder %s716_s5, %s501_s13  ;;  %s33_s10 = int_to_ptr.vmem [resolvable:$true] %s32_s10 }
   0x4   :  { %p505_p1 = scmp.lt.u32.totalorder %s501_s13, %s716_s5 }
   0x6   :  { %p507_p2 = pnand %p505_p1, %p502_p0 }
   0x8   :  { %510 = shalt.err (!%p507_p2)
}
   0x9   :  { %s511_s18 = scalar_lea.vmem %s33_s10, 1024  ;;  %p516_p4 = scmp.lt.s32.totalorder %s33_s10, %s33_s10 }
   0xa   :  { %p512_p3 = scmp.ne.s32.totalorder %s33_s10, %s511_s18  ;;  %p517_p5 = scmp.lt.s32.totalorder %s511_s18, %s511_s18 }
   0xc   :  { %p518_p6 = por %p517_p5, %p516_p4 }
   0xe   :  { %p519_p7 = pnand %p518_p6, %p512_p3 }
  0x10   :  { %522 = shalt.err (!%p519_p7)
}
  0x11   :  { %s574_s19 = smov 64   ;;  %s575_s20 = smov 4  }
  0x12   :  { %38 = dma.hbm_to_vmem [thread:$0]  %s716_s5, 1024, %s33_s10, [#allocation3], %s574_s19, %s574_s19, %s575_s20  }
  0x13   :  { %s576_s23 = smov [#allocation5]   ;;  %s523_s27 = scalar_lea.hbm %s718_s7, 1024 }
  0x14   :  { %s46_s24 = sshll.u32 %s576_s23, 4  ;;  %p524_p8 = scmp.ne.s32.totalorder %s718_s7, %s523_s27  ;;  %s47_s24 = int_to_ptr.vmem [resolvable:$true] %s46_s24 }
  0x15   :  { %p527_p9 = scmp.lt.u32.totalorder %s523_s27, %s718_s7 }
  0x17   :  { %p529_p10 = pnand %p527_p9, %p524_p8 }
  0x19   :  { %532 = shalt.err (!%p529_p10)
}
  0x1a   :  { %s533_s12 = scalar_lea.vmem %s47_s24, 1024  ;;  %p538_p12 = scmp.lt.s32.totalorder %s47_s24, %s47_s24 }
  0x1b   :  { %p534_p11 = scmp.ne.s32.totalorder %s47_s24, %s533_s12  ;;  %p539_p13 = scmp.lt.s32.totalorder %s533_s12, %s533_s12 }
  0x1d   :  { %p540_p0 = por %p539_p13, %p538_p12 }
  0x1f   :  { %p541_p1 = pnand %p540_p0, %p534_p11 }
  0x21   :  { %544 = shalt.err (!%p541_p1)
}
  0x22   :  { %52 = dma.hbm_to_vmem [thread:$0]  %s718_s7, 1024, %s47_s24, [#allocation6], %s574_s19, %s574_s19, %s575_s20  }
  0x23   :  { %567 = dma.done.wait [#allocation3], 1024  }
  0x24   :  { %568 = vsyncadd [#allocation3], 4294966272 }
  0x25   :  { %569 = dma.done.wait [#allocation6], 1024  }
  0x26   :  { %570 = vsyncadd [#allocation6], 4294966272  ;;  %v577_v0 = vmov 0.0   ;;  %vm578_vm0 = vmmov 0   ;;  %v579_v1 = vmov 0   ;;  %v482_v2 = vld [vmem:[%s713_s2] sm:$0xff]  }
  0x27   :  { %427 = vmatprep.subr.bf16.mxu0 %v577_v0  ;;  %429 = vmatprep.mubr.msk.bf16.mxu0 %vm578_vm0, %v577_v0  ;;  %v62_v3 = vld [vmem:[%s711_s0] sm:$0xf]  ;;  %vm78_vm1 = vcmask 130048   ;;  %v484_v6 = vld [vmem:[#allocation2 + $0x8] sm:$0xff]   ;;  %v485_v7 = vld [vmem:[#allocation2 + $0x10] sm:$0xff]  }
  0x28   :  { %481 = vset.pattern.permute.xlu0 %v579_v1  ;;  %433 = vmatprep.subr.bf16.mxu1 %v577_v0  ;;  %v122_v4 = vld [vmem:[%s712_s1] sm:$0xff]  ;;  %v486_v8 = vld [vmem:[#allocation2 + $0x18] sm:$0xff]   ;;  %v488_v10 = vld [vmem:[#allocation2 + $0x28] sm:$0xff]  }
  0x29   :  { %449 = vmatprep.mubr.msk.bf16.mxu1 %vm578_vm0, %v577_v0  ;;  %428 = vmatpush3.bf16.msra.mxu0 %v482_v2  ;;  %v483_v5 = vld [vmem:[#allocation2] sm:$0xff]   ;;  %v489_v11 = vld [vmem:[#allocation2 + $0x30] sm:$0xff]   ;;  %v490_v12 = vld [vmem:[#allocation2 + $0x38] sm:$0xff]  }
  0x2a   :  { %126 = vperm.xlu0 %481, %v122_v4   ;;  %453 = vmatprep.subr.bf16.mxu0 %v577_v0  ;;  %v487_v9 = vld [vmem:[#allocation2 + $0x20] sm:$0xff]   ;;  %v492_v14 = vld [vmem:[#allocation5 + $0x8] sm:$0xff]   ;;  %v493_v15 = vld [vmem:[#allocation5 + $0x10] sm:$0xff]  }
  0x2b   :  { %434 = vmatpush3.bf16.msra.mxu1 %v483_v5  ;;  %v491_v13 = vld [vmem:[#allocation5] sm:$0xff]   ;;  %v494_v16 = vld [vmem:[#allocation5 + $0x18] sm:$0xff]   ;;  %v496_v18 = vld [vmem:[#allocation5 + $0x28] sm:$0xff]  }
  0x2c   :  { %430 = vmatmul.mubr.msk.bf16.vlgmr.msra.gmra.mrb[0].mxu0 %vm78_vm1, %v62_v3  ;;  %435 = vmatprep.subr.bf16.mxu1 %v577_v0  ;;  %v495_v17 = vld [vmem:[#allocation5 + $0x20] sm:$0xff]   ;;  %v497_v31 = vld [vmem:[#allocation5 + $0x30] sm:$0xff]   ;;  %v498_v32 = vld [vmem:[#allocation5 + $0x38] sm:$0xff]  }
  0x2d   :  { %469 = vmatprep.mubr.msk.bf16.mxu0 %vm578_vm0, %v577_v0  ;;  %454 = vmatpush3.bf16.msra.mxu0 %v491_v13  ;;  %v388_v19 = vld [vmem:[%s714_s3] ss:$0 sm:$0xff] }
  0x2e   :  { %455 = vmatprep.subr.bf16.mxu0 %v577_v0  ;;  %v385_v21 = vld [vmem:[%s715_s4] ss:$0 sm:$0xff] }
  0x2f   :  { %436 = vmatpush3.bf16.msra.mxu1 %v484_v6  ;;  %v389_v33 = vld [vmem:[%s717_s6] ss:$0 sm:$0xff]  ;;  %s580_s6 = smov [#allocation7]  }
  0x30   :  { %437 = vmatprep.subr.bf16.mxu1 %v577_v0  ;;  %v398_v41 = vld [vmem:[%s719_s8] ss:$0 sm:$0xff]  ;;  %s375_s21 = sshll.u32 %s580_s6, 4  ;;  %s376_s21 = int_to_ptr.vmem [resolvable:$true] %s375_s21 }
  0x31   :  { %456 = vmatpush3.bf16.msra.mxu0 %v492_v14  ;;  %s545_s22 = scalar_lea.vmem %s376_s21, 64  ;;  %p550_p3 = scmp.lt.s32.totalorder %s376_s21, %s376_s21 }
  0x32   :  { %457 = vmatprep.subr.bf16.mxu0 %v577_v0  ;;  %p546_p2 = scmp.ne.s32.totalorder %s376_s21, %s545_s22  ;;  %p551_p4 = scmp.lt.s32.totalorder %s545_s22, %s545_s22 }
  0x33   :  { %438 = vmatpush3.bf16.msra.mxu1 %v485_v7 }
  0x34   :  { %439 = vmatprep.subr.bf16.mxu1 %v577_v0  ;;  %p552_p5 = por %p551_p4, %p550_p3 }
  0x35   :  { %458 = vmatpush3.bf16.msra.mxu0 %v493_v15 }
  0x36   :  { %459 = vmatprep.subr.bf16.mxu0 %v577_v0  ;;  %p553_p6 = pnand %p552_p5, %p546_p2 }
  0x37   :  { %440 = vmatpush3.bf16.msra.mxu1 %v486_v8 }
  0x38   :  { %441 = vmatprep.subr.bf16.mxu1 %v577_v0 }
  0x39   :  { %460 = vmatpush3.bf16.msra.mxu0 %v494_v16 }
  0x3a   :  { %461 = vmatprep.subr.bf16.mxu0 %v577_v0 }
  0x3b   :  { %442 = vmatpush3.bf16.msra.mxu1 %v487_v9 }
  0x3c   :  { %443 = vmatprep.subr.bf16.mxu1 %v577_v0 }
  0x3d   :  { %462 = vmatpush3.bf16.msra.mxu0 %v495_v17 }
  0x3e   :  { %463 = vmatprep.subr.bf16.mxu0 %v577_v0 }
  0x3f   :  { %444 = vmatpush3.bf16.msra.mxu1 %v488_v10 }
  0x40   :  { %445 = vmatprep.subr.bf16.mxu1 %v577_v0 }
  0x41   :  { %464 = vmatpush3.bf16.msra.mxu0 %v496_v18 }
  0x42   :  { %465 = vmatprep.subr.bf16.mxu0 %v577_v0 }
  0x43   :  { %446 = vmatpush3.bf16.msra.mxu1 %v489_v11 }
  0x44   :  { %447 = vmatprep.subr.bf16.mxu1 %v577_v0 }
  0x45   :  { %466 = vmatpush3.bf16.msra.mxu0 %v497_v31 }
  0x46   :  { %467 = vmatprep.subr.bf16.mxu0 %v577_v0 }
  0x47   :  { %448 = vmatpush3.bf16.msra.mxu1 %v490_v12 }
  0x49   :  { %468 = vmatpush3.bf16.msra.mxu0 %v498_v32 }
  0xa9   :  { %v127_v20 = vpop.permute.xlu0 %126 }
  0xaa   :  { %v135_v22 = vmul.f32 %v388_v19, %v127_v20 }
  0xff   :  { %v116_v23 = vpop.f32.mrb[0].mxu0 }
 0x100   :  { %v117_v24 = vadd.f32 %v385_v21, %v116_v23  ;;  %v431_v25 = vpop.f32.mrb[1].mxu0 }
 0x101   :  { %v119_v26 = vpop.f32.mrb[2].mxu0 }
 0x102   :  { %v136_v27 = vadd.f32 %v135_v22, %v117_v24  ;;  %v432_v28 = vpop.f32.mrb[3].mxu0 }
 0x104   :  { %v137_v29 = vmax.f32 %v136_v27, 0.0 }
 0x106   :  { %v138_v30 = vpack.c.bf16 %v137_v29, %v137_v29 }
 0x108   :  { %450 = vmatmul.mubr.bf16.vlgmr.msra.gmra.mrb[0].mxu1 %v138_v30 }
 0x1db   :  { %v244_v34 = vpop.f32.mrb[0].mxu1 }
 0x1dc   :  { %v245_v35 = vadd.f32 %v389_v33, %v244_v34  ;;  %v451_v36 = vpop.f32.mrb[1].mxu1 }
 0x1dd   :  { %v247_v37 = vpop.f32.mrb[2].mxu1 }
 0x1de   :  { %v250_v38 = vmax.f32 %v245_v35, 0.0  ;;  %v452_v39 = vpop.f32.mrb[3].mxu1 }
 0x1e0   :  { %v251_v40 = vpack.c.bf16 %v250_v38, %v250_v38 }
 0x1e2   :  { %470 = vmatmul.mubr.bf16.vlgmr.msra.gmra.mrb[4].mxu0 %v251_v40 }
 0x2b5   :  { %v357_v42 = vpop.f32.mrb[4].mxu0 }
 0x2b6   :  { %v358_v43 = vadd.f32 %v398_v41, %v357_v42  ;;  %v471_v44 = vpop.f32.mrb[5].mxu0 }
 0x2b7   :  { %v360_v45 = vpop.f32.mrb[6].mxu0 }
 0x2b8   :  { %v363_v46 = vmul.f32 0.5, %v358_v43  ;;  %v472_v47 = vpop.f32.mrb[7].mxu0 }
 0x2ba   :  { %499 = vtanh.f32 %v363_v46 }
 0x2c4   :  { %v500_v48 = vpop.eup %499 }
 0x2c5   :  { %v365_v49 = vmul.f32 0.5, %v500_v48 }
 0x2c7   :  { %v366_v50 = vadd.f32 0.5, %v365_v49 }
 0x2c9   :  { %v367_v51 = vpack.c.bf16 %v366_v50, %v366_v50 }
 0x2cb   :  { %368 = vst [vmem:[#allocation7] sm:$0xf] %v367_v51 }
 0x2cc   :  { %556 = shalt.err (!%p553_p6)
}
 0x2cd   :  { %s557_s24 = scalar_lea.hbm %s720_s9, 64 }
 0x2ce   :  { %p558_p7 = scmp.ne.s32.totalorder %s720_s9, %s557_s24  ;;  %p561_p8 = scmp.lt.u32.totalorder %s557_s24, %s720_s9 }
 0x2d0   :  { %p563_p9 = pnand %p561_p8, %p558_p7 }
 0x2d2   :  { %566 = shalt.err (!%p563_p9)
}
 0x2d3   :  { %378 = dma.vmem_to_hbm [thread:$0]  %s376_s21, 64, %s720_s9, [#allocation4]  }
 0x2d4   :  { %571 = dma.done.wait [#allocation4], 64  }
 0x2d5   :  { %572 = vsyncadd [#allocation4], 4294967232 }
 0x2d6   :  { %382 = vsyncpa [#allocation3], 1 }
 0x2d7   :  { %383 = vsyncpa [#allocation6], 1 }
 0x2d8   :  { %384 = vsyncpa [#allocation4], 1 }

</bundles_post_ra>
